<compile_context>
chip_gen: v5e
topology: v5e:2x2
jax: 0.10.0
libtpu: 0.0.40
codegen_flags: <defaults>
</compile_context>

<pallas_src>
import functools
import math

import jax
import jax.numpy as jnp
from jax import lax
from jax.experimental import pallas as pl
from jax.experimental.pallas import tpu as pltpu


def _round_up(x, m):
    return (x + m - 1) // m * m


def _bytes(dt):
    return jnp.dtype(dt).itemsize


def _vmem_capacity_bytes():
    try:
        return int(pltpu.get_tpu_info().vmem_capacity_bytes)
    except Exception:
        return 64 * 1024 * 1024  # conservative fallback: v7x per-TensorCore VMEM


# ---------------------------------------------------------------------------
# Stage 1: fused dense + gelu(erf) + LayerNorm over row tiles.
# ---------------------------------------------------------------------------
def _transform_kernel(eps):
    inv_sqrt2 = 1.0 / math.sqrt(2.0)

    def kernel(x_ref, wd_ref, bd_ref, g_ref, b_ref, h_ref):
        # Native-dtype operands into the MXU, f32 accumulation.
        h = jnp.dot(x_ref[...], wd_ref[...], preferred_element_type=jnp.float32)
        h = h + bd_ref[...].astype(jnp.float32)

        # gelu, exact erf form (matches the torch.erf version).
        h = h * 0.5 * (1.0 + lax.erf(h * inv_sqrt2))

        # LayerNorm over the hidden dim (f32 math).
        mean = jnp.mean(h, axis=-1, keepdims=True)
        c = h - mean
        var = jnp.mean(c * c, axis=-1, keepdims=True)
        h = c * lax.rsqrt(var + eps)
        h = h * g_ref[...].astype(jnp.float32) + b_ref[...].astype(jnp.float32)

        # Store in the decoder-matmul LHS dtype (bf16 if decoder_w is bf16).
        h_ref[...] = h.astype(h_ref.dtype)

    return kernel


def _run_transform(x2d, dense_w, bd2d, g2d, b2d, *, eps, row_tile, h_dtype,
                   vmem_limit, single_buffer_invariants):
    n_pad, H = x2d.shape
    grid = (n_pad // row_tile,)
    # Grid-invariant operands: a single VMEM buffer is enough (they are
    # fetched once); halves their footprint vs the default double buffer.
    inv_mode = pl.Buffered(1) if single_buffer_invariants else None

    cost = pl.CostEstimate(
        flops=2 * n_pad * H * H + 10 * n_pad * H,
        transcendentals=2 * n_pad * H,  # erf + rsqrt
        bytes_accessed=(n_pad * H * _bytes(x2d.dtype)
                        + H * H * _bytes(dense_w.dtype)
                        + 3 * H * 4
                        + n_pad * H * _bytes(h_dtype)),
    )

    return pl.pallas_call(
        _transform_kernel(eps),
        out_shape=jax.ShapeDtypeStruct((n_pad, H), h_dtype),
        grid_spec=pltpu.PrefetchScalarGridSpec(
            num_scalar_prefetch=0,
            grid=grid,
            in_specs=[
                pl.BlockSpec((row_tile, H), lambda i: (i, 0)),               # x rows
                pl.BlockSpec((H, H), lambda i: (0, 0),
                             pipeline_mode=inv_mode),                        # dense W
                pl.BlockSpec((1, H), lambda i: (0, 0), pipeline_mode=inv_mode),  # dense b
                pl.BlockSpec((1, H), lambda i: (0, 0), pipeline_mode=inv_mode),  # LN gamma
                pl.BlockSpec((1, H), lambda i: (0, 0), pipeline_mode=inv_mode),  # LN beta
            ],
            out_specs=pl.BlockSpec((row_tile, H), lambda i: (i, 0)),
        ),
        compiler_params=pltpu.CompilerParams(
            dimension_semantics=("parallel",),
            vmem_limit_bytes=int(vmem_limit),
        ),
        cost_estimate=cost,
    )(x2d, dense_w, bd2d, g2d, b2d)


# ---------------------------------------------------------------------------
# Stage 2: pure GEMM decoder.  Vocab axis OUTER, row axis INNER, so each
# (H, vocab_tile) weight block is DMA'd from HBM exactly once.
# ---------------------------------------------------------------------------
def _decoder_kernel(h_ref, w_ref, bv_ref, o_ref):
    out = jnp.dot(h_ref[...], w_ref[...], preferred_element_type=jnp.float32)
    out = out + bv_ref[...].astype(jnp.float32)
    o_ref[...] = out.astype(o_ref.dtype)


def _run_decoder(h2d, wdec, bv2d, *, row_tile, vocab_tile, out_dtype, vmem_limit):
    n_pad, H = h2d.shape
    v_pad = wdec.shape[1]
    grid = (v_pad // vocab_tile, n_pad // row_tile)  # vocab OUTER, rows INNER

    cost = pl.CostEstimate(
        flops=2 * n_pad * H * v_pad + n_pad * v_pad,
        transcendentals=0,
        bytes_accessed=((v_pad // vocab_tile) * n_pad * H * _bytes(h2d.dtype)  # h re-read per vocab tile
                        + H * v_pad * _bytes(wdec.dtype)                       # W read once
                        + v_pad * _bytes(bv2d.dtype)
                        + n_pad * v_pad * _bytes(out_dtype)),
    )

    return pl.pallas_call(
        _decoder_kernel,
        out_shape=jax.ShapeDtypeStruct((n_pad, v_pad), out_dtype),
        grid_spec=pltpu.PrefetchScalarGridSpec(
            num_scalar_prefetch=0,
            grid=grid,
            in_specs=[
                pl.BlockSpec((row_tile, H), lambda j, i: (i, 0)),      # h rows (inner axis)
                pl.BlockSpec((H, vocab_tile), lambda j, i: (0, j)),    # decoder W (outer axis only)
                pl.BlockSpec((1, vocab_tile), lambda j, i: (0, j)),    # vocab bias
            ],
            out_specs=pl.BlockSpec((row_tile, vocab_tile), lambda j, i: (i, j)),
        ),
        compiler_params=pltpu.CompilerParams(
            dimension_semantics=("parallel", "parallel"),
            vmem_limit_bytes=int(vmem_limit),
        ),
        cost_estimate=cost,
    )(h2d, wdec, bv2d)


# ---------------------------------------------------------------------------
# Public wrapper.
# ---------------------------------------------------------------------------
def bert_only_mlm_head(
    sequence_output,  # [B, S, H]
    dense_w,          # [H, H]  (already transposed: x @ dense_w)
    dense_b,          # [H]
    ln_gamma,         # [H]
    ln_beta,          # [H]
    decoder_w,        # [H, V]  (already transposed: h @ decoder_w)
    vocab_bias,       # [V]
    *,
    eps=1e-12,
    row_tile=None,      # auto (generation-aware)
    vocab_tile=None,    # auto (generation-aware)
    out_dtype=None,     # logits dtype; pass jnp.bfloat16 to halve the [N,V] write
    compute_dtype=None, # decoder-matmul LHS dtype; defaults to decoder_w.dtype
):
    B, S, H = sequence_output.shape
    V = decoder_w.shape[1]
    N = B * S

    out_dtype = sequence_output.dtype if out_dtype is None else jnp.dtype(out_dtype)
    h_dtype = decoder_w.dtype if compute_dtype is None else jnp.dtype(compute_dtype)

    # Generation-aware tiling / VMEM budget.
    cap = _vmem_capacity_bytes()
    budget = int(0.85 * cap)
    if row_tile is None:
        row_tile = 512
    if vocab_tile is None:
        vocab_tile = 4096 if cap >= 96 * 1024 * 1024 else 2048

    # Clamp tiles to the (padded) problem size.
    row_tile = min(row_tile, _round_up(N, 8))
    vocab_tile = min(vocab_tile, _round_up(V, 128))

    def _decoder_vmem(rt, vt):
        return (2 * rt * H * _bytes(h_dtype)
                + 2 * H * vt * _bytes(decoder_w.dtype)
                + 2 * vt * 4
                + 2 * rt * vt * _bytes(out_dtype))

    # Shrink tiles if estimated decoder buffers would exceed the VMEM budget.
    while _decoder_vmem(row_tile, vocab_tile) > budget and vocab_tile > 512:
        vocab_tile //= 2
    while _decoder_vmem(row_tile, vocab_tile) > budget and row_tile > 256:
        row_tile //= 2

    n_pad = _round_up(N, row_tile)
    v_pad = _round_up(V, vocab_tile)

    # Flatten rows and pad N / V to tile multiples (lane-dense output tiles).
    x2d = sequence_output.reshape(N, H)
    if n_pad != N:
        x2d = jnp.pad(x2d, ((0, n_pad - N), (0, 0)))
    wdec = decoder_w
    bv = vocab_bias
    if v_pad != V:
        wdec = jnp.pad(wdec, ((0, 0), (0, v_pad - V)))
        bv = jnp.pad(bv, (0, v_pad - V))

    bd2d = dense_b.reshape(1, H)
    g2d = ln_gamma.reshape(1, H)
    b2d = ln_beta.reshape(1, H)
    bv2d = bv.reshape(1, v_pad)

    transform_vmem = (2 * row_tile * H * _bytes(x2d.dtype)
                      + H * H * _bytes(dense_w.dtype)
                      + 3 * H * 4
                      + 2 * row_tile * H * _bytes(h_dtype))
    transform_limit = min(budget, max(32 * 1024 * 1024, int(1.5 * transform_vmem)))
    decoder_limit = min(budget, max(32 * 1024 * 1024,
                                    int(1.5 * _decoder_vmem(row_tile, vocab_tile))))

    # Stage 1: dense + gelu + LayerNorm -> h[N_pad, H] in the decoder LHS dtype.
    transform = functools.partial(
        _run_transform, x2d, dense_w, bd2d, g2d, b2d,
        eps=eps, row_tile=row_tile, h_dtype=h_dtype, vmem_limit=transform_limit)
    try:
        h2d = transform(single_buffer_invariants=True)
    except Exception:
        # Fallback if pipeline_mode=pl.Buffered(1) is not supported by this runtime.
        h2d = transform(single_buffer_invariants=False)

    # Stage 2: decoder GEMM, vocab-outer / rows-inner, both axes parallel.
    out = _run_decoder(h2d, wdec, bv2d, row_tile=row_tile, vocab_tile=vocab_tile,
                       out_dtype=out_dtype, vmem_limit=decoder_limit)

    return out[:N, :V].reshape(B, S, V)


# ---------------------------------------------------------------------------
# Pure-JAX reference and self-test.
# ---------------------------------------------------------------------------
def _reference(x, dense_w, dense_b, g, b, decoder_w, vocab_bias, eps=1e-12):
    h = x @ dense_w + dense_b
    h = h * 0.5 * (1.0 + lax.erf(h / jnp.sqrt(2.0)))
    mean = jnp.mean(h, axis=-1, keepdims=True)
    var = jnp.mean((h - mean) ** 2, axis=-1, keepdims=True)
    h = (h - mean) * lax.rsqrt(var + eps) * g + b
    return h @ decoder_w + vocab_bias


if __name__ == "__main__":
    # Small synthetic config: batch=2, seq=8, hidden=32, vocab=64.
    B, S, H, V = 2, 8, 32, 64
    key = jax.random.PRNGKey(0)
    k1, k2, k3, k4, k5 = jax.random.split(key, 5)

    x = jax.random.normal(k1, (B, S, H), dtype=jnp.float32)
    dense_w = jax.random.normal(k2, (H, H), dtype=jnp.float32) * 0.05
    dense_b = jax.random.normal(k3, (H,), dtype=jnp.float32) * 0.01
    ln_gamma = jnp.ones((H,), dtype=jnp.float32)
    ln_beta = jnp.zeros((H,), dtype=jnp.float32)
    decoder_w = jax.random.normal(k4, (H, V), dtype=jnp.float32) * 0.05
    vocab_bias = jax.random.normal(k5, (V,), dtype=jnp.float32) * 0.01

    out = bert_only_mlm_head(
        x, dense_w, dense_b, ln_gamma, ln_beta, decoder_w, vocab_bias
    )
    out = jax.block_until_ready(out)

    ref = _reference(x, dense_w, dense_b, ln_gamma, ln_beta, decoder_w, vocab_bias)
    assert out.shape == (B, S, V)
    assert jnp.allclose(out, ref, atol=2e-4, rtol=2e-4), "mismatch vs reference"

    print("KERNEL_OK")
</pallas_src>

<mosaic_0001>
module attributes {stable_mosaic.version = 11 : i64} {
  func.func @kernel(%arg0: i32, %arg1: memref<16x32xf32, #tpu.memory_space<vmem>>, %arg2: memref<32x32xf32, #tpu.memory_space<vmem>>, %arg3: memref<1x32xf32, #tpu.memory_space<vmem>>, %arg4: memref<1x32xf32, #tpu.memory_space<vmem>>, %arg5: memref<1x32xf32, #tpu.memory_space<vmem>>, %arg6: memref<16x32xf32, #tpu.memory_space<vmem>>) attributes {dimension_semantics = [#tpu.dimension_semantics<parallel>], iteration_bounds = array<i64: 1>, scalar_prefetch = 0 : i64, scratch_operands = 0 : i64, tpu.core_type = #tpu.core_type<tc>, window_params = [{transform_indices = @transform_0, window_bounds = array<i64: 16, 32>}, {pipeline_mode = #tpu.pipeline_mode<synchronous>, transform_indices = @transform_1, window_bounds = array<i64: 32, 32>}, {pipeline_mode = #tpu.pipeline_mode<synchronous>, transform_indices = @transform_2, window_bounds = array<i64: 1, 32>}, {pipeline_mode = #tpu.pipeline_mode<synchronous>, transform_indices = @transform_3, window_bounds = array<i64: 1, 32>}, {pipeline_mode = #tpu.pipeline_mode<synchronous>, transform_indices = @transform_4, window_bounds = array<i64: 1, 32>}, {transform_indices = @transform_5, window_bounds = array<i64: 16, 32>}]} {
    %c0 = arith.constant 0 : index
    %c0_0 = arith.constant 0 : index
    %0 = vector.load %arg1[%c0, %c0_0] : memref<16x32xf32, #tpu.memory_space<vmem>>, vector<16x32xf32>
    %c0_1 = arith.constant 0 : index
    %c0_2 = arith.constant 0 : index
    %1 = vector.load %arg2[%c0_1, %c0_2] : memref<32x32xf32, #tpu.memory_space<vmem>>, vector<32x32xf32>
    %cst = arith.constant dense<0.000000e+00> : vector<16x32xf32>
    %2 = tpu.matmul %0, %1, %cst {dimension_numbers = #tpu.dot_dimension_numbers<[1], [0], [0], [1], [0, 0, 1, 1], [], []>} : vector<16x32xf32>, vector<32x32xf32>, vector<16x32xf32> -> vector<16x32xf32>
    %c0_3 = arith.constant 0 : index
    %c0_4 = arith.constant 0 : index
    %3 = vector.load %arg3[%c0_3, %c0_4] : memref<1x32xf32, #tpu.memory_space<vmem>>, vector<1x32xf32>
    %4 = vector.broadcast %3 : vector<1x32xf32> to vector<16x32xf32>
    %5 = arith.addf %2, %4 : vector<16x32xf32>
    %cst_5 = arith.constant 5.000000e-01 : f32
    %6 = vector.broadcast %cst_5 : f32 to vector<16x32xf32>
    %7 = arith.mulf %5, %6 : vector<16x32xf32>
    %cst_6 = arith.constant 0.707106769 : f32
    %8 = vector.broadcast %cst_6 : f32 to vector<16x32xf32>
    %9 = arith.mulf %5, %8 : vector<16x32xf32>
    %10 = math.erf %9 : vector<16x32xf32>
    %cst_7 = arith.constant 1.000000e+00 : f32
    %11 = vector.broadcast %cst_7 : f32 to vector<16x32xf32>
    %12 = arith.addf %11, %10 : vector<16x32xf32>
    %13 = arith.mulf %7, %12 : vector<16x32xf32>
    %cst_8 = arith.constant dense<0.000000e+00> : vector<16xf32>
    %14 = vector.multi_reduction <add>, %13, %cst_8 [1] : vector<16x32xf32> to vector<16xf32>
    %15 = vector.shape_cast %14 : vector<16xf32> to vector<16x1xf32>
    %cst_9 = arith.constant 3.200000e+01 : f32
    %16 = vector.broadcast %cst_9 : f32 to vector<16x1xf32>
    %17 = arith.divf %15, %16 : vector<16x1xf32>
    %18 = vector.broadcast %17 : vector<16x1xf32> to vector<16x32xf32>
    %19 = arith.subf %13, %18 : vector<16x32xf32>
    %20 = arith.mulf %19, %19 : vector<16x32xf32>
    %cst_10 = arith.constant dense<0.000000e+00> : vector<16xf32>
    %21 = vector.multi_reduction <add>, %20, %cst_10 [1] : vector<16x32xf32> to vector<16xf32>
    %22 = vector.shape_cast %21 : vector<16xf32> to vector<16x1xf32>
    %cst_11 = arith.constant 3.200000e+01 : f32
    %23 = vector.broadcast %cst_11 : f32 to vector<16x1xf32>
    %24 = arith.divf %22, %23 : vector<16x1xf32>
    %cst_12 = arith.constant 9.99999996E-13 : f32
    %25 = vector.broadcast %cst_12 : f32 to vector<16x1xf32>
    %26 = arith.addf %24, %25 : vector<16x1xf32>
    %27 = math.rsqrt %26 : vector<16x1xf32>
    %28 = vector.broadcast %27 : vector<16x1xf32> to vector<16x32xf32>
    %29 = arith.mulf %19, %28 : vector<16x32xf32>
    %c0_13 = arith.constant 0 : index
    %c0_14 = arith.constant 0 : index
    %30 = vector.load %arg4[%c0_13, %c0_14] : memref<1x32xf32, #tpu.memory_space<vmem>>, vector<1x32xf32>
    %31 = vector.broadcast %30 : vector<1x32xf32> to vector<16x32xf32>
    %32 = arith.mulf %29, %31 : vector<16x32xf32>
    %c0_15 = arith.constant 0 : index
    %c0_16 = arith.constant 0 : index
    %33 = vector.load %arg5[%c0_15, %c0_16] : memref<1x32xf32, #tpu.memory_space<vmem>>, vector<1x32xf32>
    %34 = vector.broadcast %33 : vector<1x32xf32> to vector<16x32xf32>
    %35 = arith.addf %32, %34 : vector<16x32xf32>
    %c0_17 = arith.constant 0 : index
    %c0_18 = arith.constant 0 : index
    %36 = vector.load %arg6[%c0_17, %c0_18] : memref<16x32xf32, #tpu.memory_space<vmem>>, vector<16x32xf32>
    tpu.vector_store %arg6[%c0_17, %c0_18], %35 {strides = array<i32>} : memref<16x32xf32, #tpu.memory_space<vmem>>, vector<16x32xf32>,
    return
  }
  func.func @transform_0(%arg0: i32) -> (i32, i32) {
    %c0_i32 = arith.constant 0 : i32
    %c0_i32_0 = arith.constant 0 : i32
    return %arg0, %c0_i32 : i32, i32
  }
  func.func @transform_1(%arg0: i32) -> (i32, i32) {
    %c0_i32 = arith.constant 0 : i32
    %c0_i32_0 = arith.constant 0 : i32
    %c0_i32_1 = arith.constant 0 : i32
    return %c0_i32, %c0_i32_0 : i32, i32
  }
  func.func @transform_2(%arg0: i32) -> (i32, i32) {
    %c0_i32 = arith.constant 0 : i32
    %c0_i32_0 = arith.constant 0 : i32
    %c0_i32_1 = arith.constant 0 : i32
    return %c0_i32, %c0_i32_0 : i32, i32
  }
  func.func @transform_3(%arg0: i32) -> (i32, i32) {
    %c0_i32 = arith.constant 0 : i32
    %c0_i32_0 = arith.constant 0 : i32
    %c0_i32_1 = arith.constant 0 : i32
    return %c0_i32, %c0_i32_0 : i32, i32
  }
  func.func @transform_4(%arg0: i32) -> (i32, i32) {
    %c0_i32 = arith.constant 0 : i32
    %c0_i32_0 = arith.constant 0 : i32
    %c0_i32_1 = arith.constant 0 : i32
    return %c0_i32, %c0_i32_0 : i32, i32
  }
  func.func @transform_5(%arg0: i32) -> (i32, i32) {
    %c0_i32 = arith.constant 0 : i32
    %c0_i32_0 = arith.constant 0 : i32
    return %arg0, %c0_i32 : i32, i32
  }
}

module attributes {stable_mosaic.version = 11 : i64} {
  func.func @kernel(%arg0: i32, %arg1: memref<16x32xf32, #tpu.memory_space<vmem>>, %arg2: memref<32x32xf32, #tpu.memory_space<vmem>>, %arg3: memref<1x32xf32, #tpu.memory_space<vmem>>, %arg4: memref<1x32xf32, #tpu.memory_space<vmem>>, %arg5: memref<1x32xf32, #tpu.memory_space<vmem>>, %arg6: memref<16x32xf32, #tpu.memory_space<vmem>>) attributes {dimension_semantics = [#tpu.dimension_semantics<parallel>], iteration_bounds = array<i64: 1>, scalar_prefetch = 0 : i64, scratch_operands = 0 : i64, tpu.core_type = #tpu.core_type<tc>, window_params = [{transform_indices = @transform_0, window_bounds = array<i64: 16, 32>}, {pipeline_mode = #tpu.pipeline_mode<synchronous>, transform_indices = @transform_1, window_bounds = array<i64: 32, 32>}, {pipeline_mode = #tpu.pipeline_mode<synchronous>, transform_indices = @transform_2, window_bounds = array<i64: 1, 32>}, {pipeline_mode = #tpu.pipeline_mode<synchronous>, transform_indices = @transform_3, window_bounds = array<i64: 1, 32>}, {pipeline_mode = #tpu.pipeline_mode<synchronous>, transform_indices = @transform_4, window_bounds = array<i64: 1, 32>}, {transform_indices = @transform_5, window_bounds = array<i64: 16, 32>}]} {
    %c0 = arith.constant 0 : index
    %c0_0 = arith.constant 0 : index
    %0 = vector.load %arg1[%c0, %c0_0] : memref<16x32xf32, #tpu.memory_space<vmem>>, vector<16x32xf32>
    %c0_1 = arith.constant 0 : index
    %c0_2 = arith.constant 0 : index
    %1 = vector.load %arg2[%c0_1, %c0_2] : memref<32x32xf32, #tpu.memory_space<vmem>>, vector<32x32xf32>
    %cst = arith.constant dense<0.000000e+00> : vector<16x32xf32>
    %2 = tpu.matmul %0, %1, %cst {dimension_numbers = #tpu.dot_dimension_numbers<[1], [0], [0], [1], [0, 0, 1, 1], [], []>} : vector<16x32xf32>, vector<32x32xf32>, vector<16x32xf32> -> vector<16x32xf32>
    %c0_3 = arith.constant 0 : index
    %c0_4 = arith.constant 0 : index
    %3 = vector.load %arg3[%c0_3, %c0_4] : memref<1x32xf32, #tpu.memory_space<vmem>>, vector<1x32xf32>
    %4 = vector.broadcast %3 : vector<1x32xf32> to vector<16x32xf32>
    %5 = arith.addf %2, %4 : vector<16x32xf32>
    %cst_5 = arith.constant 5.000000e-01 : f32
    %6 = vector.broadcast %cst_5 : f32 to vector<16x32xf32>
    %7 = arith.mulf %5, %6 : vector<16x32xf32>
    %cst_6 = arith.constant 0.707106769 : f32
    %8 = vector.broadcast %cst_6 : f32 to vector<16x32xf32>
    %9 = arith.mulf %5, %8 : vector<16x32xf32>
    %10 = math.erf %9 : vector<16x32xf32>
    %cst_7 = arith.constant 1.000000e+00 : f32
    %11 = vector.broadcast %cst_7 : f32 to vector<16x32xf32>
    %12 = arith.addf %11, %10 : vector<16x32xf32>
    %13 = arith.mulf %7, %12 : vector<16x32xf32>
    %cst_8 = arith.constant dense<0.000000e+00> : vector<16xf32>
    %14 = vector.multi_reduction <add>, %13, %cst_8 [1] : vector<16x32xf32> to vector<16xf32>
    %15 = vector.shape_cast %14 : vector<16xf32> to vector<16x1xf32>
    %cst_9 = arith.constant 3.200000e+01 : f32
    %16 = vector.broadcast %cst_9 : f32 to vector<16x1xf32>
    %17 = arith.divf %15, %16 : vector<16x1xf32>
    %18 = vector.broadcast %17 : vector<16x1xf32> to vector<16x32xf32>
    %19 = arith.subf %13, %18 : vector<16x32xf32>
    %20 = arith.mulf %19, %19 : vector<16x32xf32>
    %cst_10 = arith.constant dense<0.000000e+00> : vector<16xf32>
    %21 = vector.multi_reduction <add>, %20, %cst_10 [1] : vector<16x32xf32> to vector<16xf32>
    %22 = vector.shape_cast %21 : vector<16xf32> to vector<16x1xf32>
    %cst_11 = arith.constant 3.200000e+01 : f32
    %23 = vector.broadcast %cst_11 : f32 to vector<16x1xf32>
    %24 = arith.divf %22, %23 : vector<16x1xf32>
    %cst_12 = arith.constant 9.99999996E-13 : f32
    %25 = vector.broadcast %cst_12 : f32 to vector<16x1xf32>
    %26 = arith.addf %24, %25 : vector<16x1xf32>
    %27 = math.rsqrt %26 : vector<16x1xf32>
    %28 = vector.broadcast %27 : vector<16x1xf32> to vector<16x32xf32>
    %29 = arith.mulf %19, %28 : vector<16x32xf32>
    %c0_13 = arith.constant 0 : index
    %c0_14 = arith.constant 0 : index
    %30 = vector.load %arg4[%c0_13, %c0_14] : memref<1x32xf32, #tpu.memory_space<vmem>>, vector<1x32xf32>
    %31 = vector.broadcast %30 : vector<1x32xf32> to vector<16x32xf32>
    %32 = arith.mulf %29, %31 : vector<16x32xf32>
    %c0_15 = arith.constant 0 : index
    %c0_16 = arith.constant 0 : index
    %33 = vector.load %arg5[%c0_15, %c0_16] : memref<1x32xf32, #tpu.memory_space<vmem>>, vector<1x32xf32>
    %34 = vector.broadcast %33 : vector<1x32xf32> to vector<16x32xf32>
    %35 = arith.addf %32, %34 : vector<16x32xf32>
    %c0_17 = arith.constant 0 : index
    %c0_18 = arith.constant 0 : index
    %36 = vector.load %arg6[%c0_17, %c0_18] : memref<16x32xf32, #tpu.memory_space<vmem>>, vector<16x32xf32>
    tpu.vector_store %arg6[%c0_17, %c0_18], %35 {strides = array<i32>} : memref<16x32xf32, #tpu.memory_space<vmem>>, vector<16x32xf32>,
    return
  }
  func.func @transform_0(%arg0: i32) -> (i32, i32) {
    %c0_i32 = arith.constant 0 : i32
    %c0_i32_0 = arith.constant 0 : i32
    return %arg0, %c0_i32 : i32, i32
  }
  func.func @transform_1(%arg0: i32) -> (i32, i32) {
    %c0_i32 = arith.constant 0 : i32
    %c0_i32_0 = arith.constant 0 : i32
    %c0_i32_1 = arith.constant 0 : i32
    return %c0_i32, %c0_i32_0 : i32, i32
  }
  func.func @transform_2(%arg0: i32) -> (i32, i32) {
    %c0_i32 = arith.constant 0 : i32
    %c0_i32_0 = arith.constant 0 : i32
    %c0_i32_1 = arith.constant 0 : i32
    return %c0_i32, %c0_i32_0 : i32, i32
  }
  func.func @transform_3(%arg0: i32) -> (i32, i32) {
    %c0_i32 = arith.constant 0 : i32
    %c0_i32_0 = arith.constant 0 : i32
    %c0_i32_1 = arith.constant 0 : i32
    return %c0_i32, %c0_i32_0 : i32, i32
  }
  func.func @transform_4(%arg0: i32) -> (i32, i32) {
    %c0_i32 = arith.constant 0 : i32
    %c0_i32_0 = arith.constant 0 : i32
    %c0_i32_1 = arith.constant 0 : i32
    return %c0_i32, %c0_i32_0 : i32, i32
  }
  func.func @transform_5(%arg0: i32) -> (i32, i32) {
    %c0_i32 = arith.constant 0 : i32
    %c0_i32_0 = arith.constant 0 : i32
    return %arg0, %c0_i32 : i32, i32
  }
}

</mosaic_0001>

<bundles_post_ra>
// kernel: tpu_custom_call.1
= control target key start
LH: loop header
LB: loop body
LE: loop exit
PB: predicated region body
PF: predicated region fallthrough
CT: control target
= control target key end

     0   :  { %10 = vsyncpa [#allocation3], 0  ;;  %s460_s0 = inlined_call_operand.hbm [shape: f32[16,32], index: 0, kind: input, shape index: {}]   ;;  %s461_s1 = inlined_call_operand.hbm [shape: f32[32,32], index: 1, kind: input, shape index: {}]   ;;  %s462_s2 = inlined_call_operand.vmem [shape: f32[1,32], index: 2, kind: input, shape index: {}]   ;;  %s463_s3 = inlined_call_operand.vmem [shape: f32[1,32], index: 3, kind: input, shape index: {}]   ;;  %s464_s4 = inlined_call_operand.vmem [shape: f32[1,32], index: 4, kind: input, shape index: {}]   ;;  %s465_s5 = inlined_call_operand.hbm [shape: f32[16,32], index: 5, kind: output, shape index: {}]  }
   0x1   :  { %11 = vsyncpa [#allocation6], 0 }
   0x2   :  { %12 = vsyncpa [#allocation4], 0  ;;  %s17_s20 = sshll.u32 %s460_s0, 4  ;;  %s371_s21 = smov [#allocation2]   ;;  %s18_s20 = int_to_ptr.hbm [resolvable:$true] %s17_s20 }
   0x3   :  { %s19_s22 = sshll.u32 %s371_s21, 4  ;;  %s30_s25 = sshll.u32 %s461_s1, 4  ;;  %s20_s22 = int_to_ptr.vmem [resolvable:$true] %s19_s22  ;;  %s31_s25 = int_to_ptr.hbm [resolvable:$true] %s30_s25 }
   0x4   :  { %s372_s26 = smov 128   ;;  %s373_s27 = smov 8  }
   0x5   :  { %25 = dma.hbm_to_vmem [thread:$0]  %s18_s20, 256, %s20_s22, [#allocation3], %s372_s26, %s372_s26, %s373_s27  }
   0x6   :  { %s374_s28 = smov [#allocation5]  }
   0x7   :  { %s32_s29 = sshll.u32 %s374_s28, 4  ;;  %s33_s29 = int_to_ptr.vmem [resolvable:$true] %s32_s29 }
   0x8   :  { %38 = dma.hbm_to_vmem [thread:$0]  %s31_s25, 512, %s33_s29, [#allocation6], %s372_s26, %s372_s26, %s373_s27  }
   0x9   :  { %365 = dma.done.wait [#allocation3], 256  }
   0xa   :  { %366 = vsyncadd [#allocation3], 4294967040 }
   0xb   :  { %367 = dma.done.wait [#allocation6], 512  }
   0xc   :  { %368 = vsyncadd [#allocation6], 4294966784  ;;  %v58_v0 = vld [vmem:[#allocation5 + $0x18] sm:$0xff]  ;;  %v57_v1 = vld [vmem:[#allocation5 + $0x10] sm:$0xff]  ;;  %vm63_vm0 = vcmask 261120   ;;  %s252_s11 = sshll.u32 %s465_s5, 4  ;;  %s253_s11 = int_to_ptr.hbm [resolvable:$true] %s252_s11 }
   0xd   :  { %82 = vmatpush.msra.mxu0 %v58_v0  ;;  %270 = vmatpush.msra.mxu1 %v58_v0  ;;  %v56_v2 = vld [vmem:[#allocation5 + $0x8] sm:$0xff]  ;;  %v55_v3 = vld [vmem:[#allocation5] sm:$0xff]  ;;  %v53_v4 = vld [vmem:[#allocation2] sm:$0xff] }
   0xe   :  { %v54_v5 = vld [vmem:[#allocation2 + $0x8] sm:$0xff]  ;;  %v280_v6 = vld [vmem:[%s462_s2] ss:$0 sm:$0xff] }
   0xf   :  { %83 = vmatpush.msra.mxu0 %v57_v1  ;;  %271 = vmatpush.msra.mxu1 %v57_v1 }
  0x11   :  { %84 = vmatpush.msra.mxu0 %v56_v2  ;;  %272 = vmatpush.msra.mxu1 %v56_v2 }
  0x13   :  { %85 = vmatpush.msra.mxu0 %v55_v3  ;;  %273 = vmatpush.msra.mxu1 %v55_v3 }
  0x14   :  { %266 = vmatmul.msk.f32.vlgmr.msra.gmra.mxu0 %vm63_vm0, %v53_v4  ;;  %267 = vmatmul.msk.f32.vlgmr.msra.gmra.mxu1 %vm63_vm0, %v54_v5 }
  0x91   :  { %v87_v7 = vpop.f32.mrf.mxu0  ;;  %v90_v8 = vpop.f32.mrf.mxu1 }
  0x92   :  { %v424_v9 = vadd.f32 %v280_v6, %v87_v7  ;;  %v426_v10 = vadd.f32 %v280_v6, %v90_v8 }
  0x94   :  { %v429_v11 = vmul.f32 0.70710677, %v424_v9  ;;  %v432_v12 = vmul.f32 0.70710677, %v426_v10 }
  0x96   :  { %v97_v13 = vmul.f32 %v429_v11, %v429_v11  ;;  %v137_v14 = vmul.f32 %v432_v12, %v432_v12 }
  0x98   :  { %v98_v15 = vmin.f32 %v97_v13, 16.0  ;;  %v138_v16 = vmin.f32 %v137_v14, 16.0 }
  0x9a   :  { %v99_v17 = vmul.f32 2.1237322e-06, %v98_v15  ;;  %v139_v18 = vmul.f32 2.1237322e-06, %v138_v16  ;;  %v110_v19 = vmul.f32 3.8918573e-05, %v98_v15 }
  0x9b   :  { %v150_v20 = vmul.f32 3.8918573e-05, %v138_v16 }
  0x9c   :  { %v100_v21 = vadd.f32 0.00028619796, %v99_v17  ;;  %v140_v22 = vadd.f32 0.00028619796, %v139_v18  ;;  %v111_v23 = vadd.f32 0.001143296, %v110_v19 }
  0x9d   :  { %v151_v24 = vadd.f32 0.001143296, %v150_v20 }
  0x9e   :  { %v101_v25 = vmul.f32 %v100_v21, %v98_v15  ;;  %v141_v26 = vmul.f32 %v140_v22, %v138_v16  ;;  %v112_v27 = vmul.f32 %v111_v23, %v98_v15  ;;  %v93_v22 = vmul.f32 0.5, %v424_v9 }
  0x9f   :  { %v152_v28 = vmul.f32 %v151_v24, %v138_v16 }
  0xa0   :  { %v102_v29 = vadd.f32 0.0036580483, %v101_v25  ;;  %v113_v30 = vadd.f32 0.014752088, %v112_v27  ;;  %v142_v32 = vadd.f32 0.0036580483, %v141_v26 }
  0xa1   :  { %v153_v31 = vadd.f32 0.014752088, %v152_v28  ;;  %v94_v27 = vmul.f32 0.5, %v426_v10 }
  0xa2   :  { %v114_v33 = vmul.f32 %v113_v30, %v98_v15  ;;  %v103_v35 = vmul.f32 %v102_v29, %v98_v15  ;;  %v143_v38 = vmul.f32 %v142_v32, %v138_v16  ;;  %v375_v29 = vmov 32.0  }
  0xa3   :  { %v154_v34 = vmul.f32 %v153_v31, %v138_v16 }
  0xa4   :  { %v115_v36 = vadd.f32 0.112945676, %v114_v33  ;;  %v104_v41 = vadd.f32 0.05243302, %v103_v35  ;;  %v144_v44 = vadd.f32 0.05243302, %v143_v38 }
  0xa5   :  { %v155_v37 = vadd.f32 0.112945676, %v154_v34 }
  0xa6   :  { %v116_v39 = vmul.f32 %v115_v36, %v98_v15  ;;  %v105_v47 = vmul.f32 %v104_v41, %v98_v15  ;;  %v145_v50 = vmul.f32 %v144_v44, %v138_v16 }
  0xa7   :  { %v156_v40 = vmul.f32 %v155_v37, %v138_v16 }
  0xa8   :  { %v117_v42 = vadd.f32 0.4994258, %v116_v39  ;;  %v106_v51 = vadd.f32 0.18741608, %v105_v47  ;;  %v146_v52 = vadd.f32 0.18741608, %v145_v50 }
  0xa9   :  { %v157_v43 = vadd.f32 0.4994258, %v156_v40 }
  0xaa   :  { %v118_v45 = vmul.f32 %v117_v42, %v98_v15  ;;  %v107_v54 = vmul.f32 %v106_v51, %v98_v15  ;;  %v147_v57 = vmul.f32 %v146_v52, %v138_v16 }
  0xab   :  { %v158_v46 = vmul.f32 %v157_v43, %v138_v16 }
  0xac   :  { %v119_v48 = vadd.f32 1.0, %v118_v45  ;;  %v108_v60 = vadd.f32 1.1283791, %v107_v54  ;;  %v148_v2 = vadd.f32 1.1283791, %v147_v57 }
  0xad   :  { %v159_v49 = vadd.f32 1.0, %v158_v46 }
  0xae   :  { %283 = vrcp.f32 %v119_v48  ;;  %v131_v61 = vand.u32 2147483648, %v119_v48  ;;  %v129_v0 = vand.u32 2147483647, %v119_v48  ;;  %vm125_vm3 = vweird.f32 %v119_v48 }
  0xaf   :  { %285 = vrcp.f32 %v159_v49  ;;  %v171_v1 = vand.u32 2147483648, %v159_v49  ;;  %v169_v4 = vand.u32 2147483647, %v159_v49  ;;  %vm165_vm5 = vweird.f32 %v159_v49 }
  0xb0   :  { %v132_v6 = vor.u32 1.1754944e-38, %v131_v61  ;;  %v109_v8 = vmul.f32 %v108_v60, %v429_v11  ;;  %vm130_vm6 = vcmp.eq.f32.partialorder %v129_v0, 8.507059e+37  ;;  %v149_v15 = vmul.f32 %v148_v2, %v432_v12 }
  0xb1   :  { %v172_v14 = vor.u32 1.1754944e-38, %v171_v1  ;;  %vm170_vm8 = vcmp.eq.f32.partialorder %v169_v4, 8.507059e+37  ;;  %287 = vrcp.f32 %v375_v29 }
  0xb4   :  { %v284_v53 = vpop.eup %283 }
  0xb5   :  { %v286_v55 = vpop.eup %285  ;;  %v121_v56 = vmul.f32 %v284_v53, %v119_v48  ;;  %vm126_vm1 = vweird.f32 %v284_v53 }
  0xb6   :  { %v161_v58 = vmul.f32 %v286_v55, %v159_v49  ;;  %vm166_vm2 = vweird.f32 %v286_v55  ;;  %vm127_vm4 = vmor %vm125_vm3, %vm126_vm1 }
  0xb7   :  { %v122_v59 = vsub.f32 1.0, %v121_v56  ;;  %vm167_vm7 = vmor %vm165_vm5, %vm166_vm2  ;;  %v288_v30 = vpop.eup %287 }
  0xb8   :  { %v162_v62 = vsub.f32 1.0, %v161_v58  ;;  %v188_v31 = vmul.f32 32.0, %v288_v30  ;;  %vm192_vm9 = vweird.f32 %v288_v30  ;;  %v281_v58 = vld [vmem:[%s463_s3] ss:$0 sm:$0xff]  ;;  %s376_s3 = smov [#allocation7]  }
  0xb9   :  { %v123_v63 = vmul.f32 %v284_v53, %v122_v59  ;;  %s250_s8 = sshll.u32 %s376_s3, 4  ;;  %s251_s8 = int_to_ptr.vmem [resolvable:$true] %s250_s8 }
  0xba   :  { %v163_v3 = vmul.f32 %v286_v55, %v162_v62  ;;  %v189_v32 = vsub.f32 1.0, %v188_v31  ;;  %v282_v62 = vld [vmem:[%s464_s4] ss:$0 sm:$0xff] }
  0xbb   :  { %v124_v5 = vadd.f32 %v284_v53, %v123_v63 }
  0xbc   :  { %v164_v7 = vadd.f32 %v286_v55, %v163_v3  ;;  %v190_v33 = vmul.f32 %v288_v30, %v189_v32 }
  0xbd   :  { %v128_v13 = vsel %vm127_vm4, %v284_v53, %v124_v5 }
  0xbe   :  { %v133_v16 = vsel %vm130_vm6, %v132_v6, %v128_v13  ;;  %v168_v17 = vsel %vm167_vm7, %v286_v55, %v164_v7  ;;  %v191_v9 = vadd.f32 %v288_v30, %v190_v33 }
  0xbf   :  { %v134_v18 = vmul.f32 %v133_v16, %v109_v8  ;;  %v173_v19 = vsel %vm170_vm8, %v172_v14, %v168_v17 }
  0xc0   :  { %v174_v20 = vmul.f32 %v173_v19, %v149_v15  ;;  %v193_v34 = vsel %vm192_vm9, %v288_v30, %v191_v9 }
  0xc1   :  { %v268_v21 = vclamps-f32 %v134_v18, 1.0 }
  0xc2   :  { %v269_v24 = vclamps-f32 %v174_v20, 1.0 }
  0xc3   :  { %v177_v23 = vadd.f32 1.0, %v268_v21 }
  0xc4   :  { %v178_v26 = vadd.f32 1.0, %v269_v24 }
  0xc5   :  { %v179_v25 = vmul.f32 %v177_v23, %v93_v22 }
  0xc6   :  { %v180_v28 = vmul.f32 %v178_v26, %v94_v27 }
  0xc7   :  { %v181_v11 = vsel %vm63_vm0, %v179_v25, 0.0 }
  0xc8   :  { %182 = vadd.xlane.f32.xlu0 %v181_v11  ;;  %v184_v12 = vsel %vm63_vm0, %v180_v28, 0.0 }
  0xd0   :  { %185 = vadd.xlane.f32.xlu0 %v184_v12 }
 0x13b   :  { %v183_v35 = vpop.xlane.xlu0 %182 }
 0x13c   :  { %v194_v36 = vmul.f32 %v193_v34, %v183_v35 }
 0x13e   :  { %v196_v37 = vsub.f32 %v179_v25, %v194_v36 }
 0x140   :  { %v198_v38 = vmul.f32 %v196_v37, %v196_v37 }
 0x142   :  { %v200_v39 = vsel %vm63_vm0, %v198_v38, 0.0 }
 0x143   :  { %201 = vadd.xlane.f32.xlu1 %v200_v39  ;;  %v186_v10 = vpop.xlane.xlu0 %185 }
 0x144   :  { %v195_v40 = vmul.f32 %v193_v34, %v186_v10 }
 0x146   :  { %v197_v41 = vsub.f32 %v180_v28, %v195_v40 }
 0x148   :  { %v199_v42 = vmul.f32 %v197_v41, %v197_v41 }
 0x14a   :  { %v203_v43 = vsel %vm63_vm0, %v199_v42, 0.0 }
 0x14b   :  { %204 = vadd.xlane.f32.xlu1 %v203_v43 }
 0x1b6   :  { %v202_v44 = vpop.xlane.xlu1 %201 }
 0x1b7   :  { %v206_v45 = vmul.f32 %v202_v44, %v193_v34 }
 0x1b9   :  { %v208_v46 = vadd.f32 1e-12, %v206_v45 }
 0x1bb   :  { %289 = vrsqrt.f32 %v208_v46  ;;  %vm216_vm11 = vweird.f32 %v208_v46 }
 0x1be   :  { %v205_v47 = vpop.xlane.xlu1 %204 }
 0x1bf   :  { %v207_v48 = vmul.f32 %v205_v47, %v193_v34 }
 0x1c1   :  { %v290_v49 = vpop.eup %289  ;;  %v209_v50 = vadd.f32 1e-12, %v207_v48 }
 0x1c2   :  { %v211_v51 = vmul.f32 %v290_v49, %v208_v46  ;;  %vm217_vm10 = vweird.f32 %v290_v49 }
 0x1c3   :  { %291 = vrsqrt.f32 %v209_v50  ;;  %vm218_vm12 = vmor %vm216_vm11, %vm217_vm10  ;;  %vm226_vm14 = vweird.f32 %v209_v50 }
 0x1c4   :  { %v212_v52 = vmul.f32 %v290_v49, %v211_v51 }
 0x1c6   :  { %v213_v53 = vmul.f32 0.5, %v212_v52 }
 0x1c8   :  { %v214_v54 = vsub.f32 1.5, %v213_v53 }
 0x1c9   :  { %v292_v55 = vpop.eup %291 }
 0x1ca   :  { %v215_v56 = vmul.f32 %v290_v49, %v214_v54  ;;  %v221_v57 = vmul.f32 %v292_v55, %v209_v50  ;;  %vm227_vm13 = vweird.f32 %v292_v55 }
 0x1cb   :  { %vm228_vm15 = vmor %vm226_vm14, %vm227_vm13 }
 0x1cc   :  { %v219_v59 = vsel %vm218_vm12, %v290_v49, %v215_v56  ;;  %v222_v60 = vmul.f32 %v292_v55, %v221_v57 }
 0x1cd   :  { %v230_v61 = vmul.f32 %v219_v59, %v196_v37 }
 0x1ce   :  { %v223_v63 = vmul.f32 0.5, %v222_v60 }
 0x1cf   :  { %v236_v0 = vmul.f32 %v281_v58, %v230_v61 }
 0x1d0   :  { %v224_v1 = vsub.f32 1.5, %v223_v63 }
 0x1d1   :  { %v242_v2 = vadd.f32 %v282_v62, %v236_v0 }
 0x1d2   :  { %v225_v3 = vmul.f32 %v292_v55, %v224_v1 }
 0x1d3   :  { %244 = vst.msk [vmem:[#allocation7] sm:$0xff] %vm63_vm0, %v242_v2 }
 0x1d4   :  { %v229_v4 = vsel %vm228_vm15, %v292_v55, %v225_v3 }
 0x1d5   :  { %v231_v5 = vmul.f32 %v229_v4, %v197_v41 }
 0x1d7   :  { %v237_v6 = vmul.f32 %v281_v58, %v231_v5 }
 0x1d9   :  { %v243_v7 = vadd.f32 %v282_v62, %v237_v6 }
 0x1db   :  { %245 = vst.msk [vmem:[#allocation7 + $0x8] sm:$0xff] %vm63_vm0, %v243_v7 }
 0x1dc   :  { %258 = dma.vmem_to_hbm [thread:$0]  %s251_s8, 256, %s253_s11, [#allocation4], %s372_s26, %s372_s26, %s373_s27  }
 0x1dd   :  { %369 = dma.done.wait [#allocation4], 256  }
 0x1de   :  { %370 = vsyncadd [#allocation4], 4294967040 }
 0x1df   :  { %263 = vsyncpa [#allocation3], 1 }
 0x1e0   :  { %264 = vsyncpa [#allocation6], 1 }
 0x1e1   :  { %265 = vsyncpa [#allocation4], 1 }

// kernel: tpu_custom_call.1
= control target key start
LH: loop header
LB: loop body
LE: loop exit
PB: predicated region body
PF: predicated region fallthrough
CT: control target
= control target key end

     0   :  { %10 = vsyncpa [#allocation3], 0  ;;  %s460_s0 = inlined_call_operand.hbm [shape: f32[16,32], index: 0, kind: input, shape index: {}]   ;;  %s461_s1 = inlined_call_operand.hbm [shape: f32[32,32], index: 1, kind: input, shape index: {}]   ;;  %s462_s2 = inlined_call_operand.vmem [shape: f32[1,32], index: 2, kind: input, shape index: {}]   ;;  %s463_s3 = inlined_call_operand.vmem [shape: f32[1,32], index: 3, kind: input, shape index: {}]   ;;  %s464_s4 = inlined_call_operand.vmem [shape: f32[1,32], index: 4, kind: input, shape index: {}]   ;;  %s465_s5 = inlined_call_operand.hbm [shape: f32[16,32], index: 5, kind: output, shape index: {}]  }
   0x1   :  { %11 = vsyncpa [#allocation6], 0 }
   0x2   :  { %12 = vsyncpa [#allocation4], 0  ;;  %s17_s20 = sshll.u32 %s460_s0, 4  ;;  %s371_s21 = smov [#allocation2]   ;;  %s18_s20 = int_to_ptr.hbm [resolvable:$true] %s17_s20 }
   0x3   :  { %s19_s22 = sshll.u32 %s371_s21, 4  ;;  %s30_s25 = sshll.u32 %s461_s1, 4  ;;  %s20_s22 = int_to_ptr.vmem [resolvable:$true] %s19_s22  ;;  %s31_s25 = int_to_ptr.hbm [resolvable:$true] %s30_s25 }
   0x4   :  { %s372_s26 = smov 128   ;;  %s373_s27 = smov 8  }
   0x5   :  { %25 = dma.hbm_to_vmem [thread:$0]  %s18_s20, 256, %s20_s22, [#allocation3], %s372_s26, %s372_s26, %s373_s27  }
   0x6   :  { %s374_s28 = smov [#allocation5]  }
   0x7   :  { %s32_s29 = sshll.u32 %s374_s28, 4  ;;  %s33_s29 = int_to_ptr.vmem [resolvable:$true] %s32_s29 }
   0x8   :  { %38 = dma.hbm_to_vmem [thread:$0]  %s31_s25, 512, %s33_s29, [#allocation6], %s372_s26, %s372_s26, %s373_s27  }
   0x9   :  { %365 = dma.done.wait [#allocation3], 256  }
   0xa   :  { %366 = vsyncadd [#allocation3], 4294967040 }
   0xb   :  { %367 = dma.done.wait [#allocation6], 512  }
   0xc   :  { %368 = vsyncadd [#allocation6], 4294966784  ;;  %v58_v0 = vld [vmem:[#allocation5 + $0x18] sm:$0xff]  ;;  %v57_v1 = vld [vmem:[#allocation5 + $0x10] sm:$0xff]  ;;  %vm63_vm0 = vcmask 261120   ;;  %s252_s11 = sshll.u32 %s465_s5, 4  ;;  %s253_s11 = int_to_ptr.hbm [resolvable:$true] %s252_s11 }
   0xd   :  { %82 = vmatpush.msra.mxu0 %v58_v0  ;;  %270 = vmatpush.msra.mxu1 %v58_v0  ;;  %v56_v2 = vld [vmem:[#allocation5 + $0x8] sm:$0xff]  ;;  %v55_v3 = vld [vmem:[#allocation5] sm:$0xff]  ;;  %v53_v4 = vld [vmem:[#allocation2] sm:$0xff] }
   0xe   :  { %v54_v5 = vld [vmem:[#allocation2 + $0x8] sm:$0xff]  ;;  %v280_v6 = vld [vmem:[%s462_s2] ss:$0 sm:$0xff] }
   0xf   :  { %83 = vmatpush.msra.mxu0 %v57_v1  ;;  %271 = vmatpush.msra.mxu1 %v57_v1 }
  0x11   :  { %84 = vmatpush.msra.mxu0 %v56_v2  ;;  %272 = vmatpush.msra.mxu1 %v56_v2 }
  0x13   :  { %85 = vmatpush.msra.mxu0 %v55_v3  ;;  %273 = vmatpush.msra.mxu1 %v55_v3 }
  0x14   :  { %266 = vmatmul.msk.f32.vlgmr.msra.gmra.mxu0 %vm63_vm0, %v53_v4  ;;  %267 = vmatmul.msk.f32.vlgmr.msra.gmra.mxu1 %vm63_vm0, %v54_v5 }
  0x91   :  { %v87_v7 = vpop.f32.mrf.mxu0  ;;  %v90_v8 = vpop.f32.mrf.mxu1 }
  0x92   :  { %v424_v9 = vadd.f32 %v280_v6, %v87_v7  ;;  %v426_v10 = vadd.f32 %v280_v6, %v90_v8 }
  0x94   :  { %v429_v11 = vmul.f32 0.70710677, %v424_v9  ;;  %v432_v12 = vmul.f32 0.70710677, %v426_v10 }
  0x96   :  { %v97_v13 = vmul.f32 %v429_v11, %v429_v11  ;;  %v137_v14 = vmul.f32 %v432_v12, %v432_v12 }
  0x98   :  { %v98_v15 = vmin.f32 %v97_v13, 16.0  ;;  %v138_v16 = vmin.f32 %v137_v14, 16.0 }
  0x9a   :  { %v99_v17 = vmul.f32 2.1237322e-06, %v98_v15  ;;  %v139_v18 = vmul.f32 2.1237322e-06, %v138_v16  ;;  %v110_v19 = vmul.f32 3.8918573e-05, %v98_v15 }
  0x9b   :  { %v150_v20 = vmul.f32 3.8918573e-05, %v138_v16 }
  0x9c   :  { %v100_v21 = vadd.f32 0.00028619796, %v99_v17  ;;  %v140_v22 = vadd.f32 0.00028619796, %v139_v18  ;;  %v111_v23 = vadd.f32 0.001143296, %v110_v19 }
  0x9d   :  { %v151_v24 = vadd.f32 0.001143296, %v150_v20 }
  0x9e   :  { %v101_v25 = vmul.f32 %v100_v21, %v98_v15  ;;  %v141_v26 = vmul.f32 %v140_v22, %v138_v16  ;;  %v112_v27 = vmul.f32 %v111_v23, %v98_v15  ;;  %v93_v22 = vmul.f32 0.5, %v424_v9 }
  0x9f   :  { %v152_v28 = vmul.f32 %v151_v24, %v138_v16 }
  0xa0   :  { %v102_v29 = vadd.f32 0.0036580483, %v101_v25  ;;  %v113_v30 = vadd.f32 0.014752088, %v112_v27  ;;  %v142_v32 = vadd.f32 0.0036580483, %v141_v26 }
  0xa1   :  { %v153_v31 = vadd.f32 0.014752088, %v152_v28  ;;  %v94_v27 = vmul.f32 0.5, %v426_v10 }
  0xa2   :  { %v114_v33 = vmul.f32 %v113_v30, %v98_v15  ;;  %v103_v35 = vmul.f32 %v102_v29, %v98_v15  ;;  %v143_v38 = vmul.f32 %v142_v32, %v138_v16  ;;  %v375_v29 = vmov 32.0  }
  0xa3   :  { %v154_v34 = vmul.f32 %v153_v31, %v138_v16 }
  0xa4   :  { %v115_v36 = vadd.f32 0.112945676, %v114_v33  ;;  %v104_v41 = vadd.f32 0.05243302, %v103_v35  ;;  %v144_v44 = vadd.f32 0.05243302, %v143_v38 }
  0xa5   :  { %v155_v37 = vadd.f32 0.112945676, %v154_v34 }
  0xa6   :  { %v116_v39 = vmul.f32 %v115_v36, %v98_v15  ;;  %v105_v47 = vmul.f32 %v104_v41, %v98_v15  ;;  %v145_v50 = vmul.f32 %v144_v44, %v138_v16 }
  0xa7   :  { %v156_v40 = vmul.f32 %v155_v37, %v138_v16 }
  0xa8   :  { %v117_v42 = vadd.f32 0.4994258, %v116_v39  ;;  %v106_v51 = vadd.f32 0.18741608, %v105_v47  ;;  %v146_v52 = vadd.f32 0.18741608, %v145_v50 }
  0xa9   :  { %v157_v43 = vadd.f32 0.4994258, %v156_v40 }
  0xaa   :  { %v118_v45 = vmul.f32 %v117_v42, %v98_v15  ;;  %v107_v54 = vmul.f32 %v106_v51, %v98_v15  ;;  %v147_v57 = vmul.f32 %v146_v52, %v138_v16 }
  0xab   :  { %v158_v46 = vmul.f32 %v157_v43, %v138_v16 }
  0xac   :  { %v119_v48 = vadd.f32 1.0, %v118_v45  ;;  %v108_v60 = vadd.f32 1.1283791, %v107_v54  ;;  %v148_v2 = vadd.f32 1.1283791, %v147_v57 }
  0xad   :  { %v159_v49 = vadd.f32 1.0, %v158_v46 }
  0xae   :  { %283 = vrcp.f32 %v119_v48  ;;  %v131_v61 = vand.u32 2147483648, %v119_v48  ;;  %v129_v0 = vand.u32 2147483647, %v119_v48  ;;  %vm125_vm3 = vweird.f32 %v119_v48 }
  0xaf   :  { %285 = vrcp.f32 %v159_v49  ;;  %v171_v1 = vand.u32 2147483648, %v159_v49  ;;  %v169_v4 = vand.u32 2147483647, %v159_v49  ;;  %vm165_vm5 = vweird.f32 %v159_v49 }
  0xb0   :  { %v132_v6 = vor.u32 1.1754944e-38, %v131_v61  ;;  %v109_v8 = vmul.f32 %v108_v60, %v429_v11  ;;  %vm130_vm6 = vcmp.eq.f32.partialorder %v129_v0, 8.507059e+37  ;;  %v149_v15 = vmul.f32 %v148_v2, %v432_v12 }
  0xb1   :  { %v172_v14 = vor.u32 1.1754944e-38, %v171_v1  ;;  %vm170_vm8 = vcmp.eq.f32.partialorder %v169_v4, 8.507059e+37  ;;  %287 = vrcp.f32 %v375_v29 }
  0xb4   :  { %v284_v53 = vpop.eup %283 }
  0xb5   :  { %v286_v55 = vpop.eup %285  ;;  %v121_v56 = vmul.f32 %v284_v53, %v119_v48  ;;  %vm126_vm1 = vweird.f32 %v284_v53 }
  0xb6   :  { %v161_v58 = vmul.f32 %v286_v55, %v159_v49  ;;  %vm166_vm2 = vweird.f32 %v286_v55  ;;  %vm127_vm4 = vmor %vm125_vm3, %vm126_vm1 }
  0xb7   :  { %v122_v59 = vsub.f32 1.0, %v121_v56  ;;  %vm167_vm7 = vmor %vm165_vm5, %vm166_vm2  ;;  %v288_v30 = vpop.eup %287 }
  0xb8   :  { %v162_v62 = vsub.f32 1.0, %v161_v58  ;;  %v188_v31 = vmul.f32 32.0, %v288_v30  ;;  %vm192_vm9 = vweird.f32 %v288_v30  ;;  %v281_v58 = vld [vmem:[%s463_s3] ss:$0 sm:$0xff]  ;;  %s376_s3 = smov [#allocation7]  }
  0xb9   :  { %v123_v63 = vmul.f32 %v284_v53, %v122_v59  ;;  %s250_s8 = sshll.u32 %s376_s3, 4  ;;  %s251_s8 = int_to_ptr.vmem [resolvable:$true] %s250_s8 }
  0xba   :  { %v163_v3 = vmul.f32 %v286_v55, %v162_v62  ;;  %v189_v32 = vsub.f32 1.0, %v188_v31  ;;  %v282_v62 = vld [vmem:[%s464_s4] ss:$0 sm:$0xff] }
  0xbb   :  { %v124_v5 = vadd.f32 %v284_v53, %v123_v63 }
  0xbc   :  { %v164_v7 = vadd.f32 %v286_v55, %v163_v3  ;;  %v190_v33 = vmul.f32 %v288_v30, %v189_v32 }
  0xbd   :  { %v128_v13 = vsel %vm127_vm4, %v284_v53, %v124_v5 }
  0xbe   :  { %v133_v16 = vsel %vm130_vm6, %v132_v6, %v128_v13  ;;  %v168_v17 = vsel %vm167_vm7, %v286_v55, %v164_v7  ;;  %v191_v9 = vadd.f32 %v288_v30, %v190_v33 }
  0xbf   :  { %v134_v18 = vmul.f32 %v133_v16, %v109_v8  ;;  %v173_v19 = vsel %vm170_vm8, %v172_v14, %v168_v17 }
  0xc0   :  { %v174_v20 = vmul.f32 %v173_v19, %v149_v15  ;;  %v193_v34 = vsel %vm192_vm9, %v288_v30, %v191_v9 }
  0xc1   :  { %v268_v21 = vclamps-f32 %v134_v18, 1.0 }
  0xc2   :  { %v269_v24 = vclamps-f32 %v174_v20, 1.0 }
  0xc3   :  { %v177_v23 = vadd.f32 1.0, %v268_v21 }
  0xc4   :  { %v178_v26 = vadd.f32 1.0, %v269_v24 }
  0xc5   :  { %v179_v25 = vmul.f32 %v177_v23, %v93_v22 }
  0xc6   :  { %v180_v28 = vmul.f32 %v178_v26, %v94_v27 }
  0xc7   :  { %v181_v11 = vsel %vm63_vm0, %v179_v25, 0.0 }
  0xc8   :  { %182 = vadd.xlane.f32.xlu0 %v181_v11  ;;  %v184_v12 = vsel %vm63_vm0, %v180_v28, 0.0 }
  0xd0   :  { %185 = vadd.xlane.f32.xlu0 %v184_v12 }
 0x13b   :  { %v183_v35 = vpop.xlane.xlu0 %182 }
 0x13c   :  { %v194_v36 = vmul.f32 %v193_v34, %v183_v35 }
 0x13e   :  { %v196_v37 = vsub.f32 %v179_v25, %v194_v36 }
 0x140   :  { %v198_v38 = vmul.f32 %v196_v37, %v196_v37 }
 0x142   :  { %v200_v39 = vsel %vm63_vm0, %v198_v38, 0.0 }
 0x143   :  { %201 = vadd.xlane.f32.xlu1 %v200_v39  ;;  %v186_v10 = vpop.xlane.xlu0 %185 }
 0x144   :  { %v195_v40 = vmul.f32 %v193_v34, %v186_v10 }
 0x146   :  { %v197_v41 = vsub.f32 %v180_v28, %v195_v40 }
 0x148   :  { %v199_v42 = vmul.f32 %v197_v41, %v197_v41 }
 0x14a   :  { %v203_v43 = vsel %vm63_vm0, %v199_v42, 0.0 }
 0x14b   :  { %204 = vadd.xlane.f32.xlu1 %v203_v43 }
 0x1b6   :  { %v202_v44 = vpop.xlane.xlu1 %201 }
 0x1b7   :  { %v206_v45 = vmul.f32 %v202_v44, %v193_v34 }
 0x1b9   :  { %v208_v46 = vadd.f32 1e-12, %v206_v45 }
 0x1bb   :  { %289 = vrsqrt.f32 %v208_v46  ;;  %vm216_vm11 = vweird.f32 %v208_v46 }
 0x1be   :  { %v205_v47 = vpop.xlane.xlu1 %204 }
 0x1bf   :  { %v207_v48 = vmul.f32 %v205_v47, %v193_v34 }
 0x1c1   :  { %v290_v49 = vpop.eup %289  ;;  %v209_v50 = vadd.f32 1e-12, %v207_v48 }
 0x1c2   :  { %v211_v51 = vmul.f32 %v290_v49, %v208_v46  ;;  %vm217_vm10 = vweird.f32 %v290_v49 }
 0x1c3   :  { %291 = vrsqrt.f32 %v209_v50  ;;  %vm218_vm12 = vmor %vm216_vm11, %vm217_vm10  ;;  %vm226_vm14 = vweird.f32 %v209_v50 }
 0x1c4   :  { %v212_v52 = vmul.f32 %v290_v49, %v211_v51 }
 0x1c6   :  { %v213_v53 = vmul.f32 0.5, %v212_v52 }
 0x1c8   :  { %v214_v54 = vsub.f32 1.5, %v213_v53 }
 0x1c9   :  { %v292_v55 = vpop.eup %291 }
 0x1ca   :  { %v215_v56 = vmul.f32 %v290_v49, %v214_v54  ;;  %v221_v57 = vmul.f32 %v292_v55, %v209_v50  ;;  %vm227_vm13 = vweird.f32 %v292_v55 }
 0x1cb   :  { %vm228_vm15 = vmor %vm226_vm14, %vm227_vm13 }
 0x1cc   :  { %v219_v59 = vsel %vm218_vm12, %v290_v49, %v215_v56  ;;  %v222_v60 = vmul.f32 %v292_v55, %v221_v57 }
 0x1cd   :  { %v230_v61 = vmul.f32 %v219_v59, %v196_v37 }
 0x1ce   :  { %v223_v63 = vmul.f32 0.5, %v222_v60 }
 0x1cf   :  { %v236_v0 = vmul.f32 %v281_v58, %v230_v61 }
 0x1d0   :  { %v224_v1 = vsub.f32 1.5, %v223_v63 }
 0x1d1   :  { %v242_v2 = vadd.f32 %v282_v62, %v236_v0 }
 0x1d2   :  { %v225_v3 = vmul.f32 %v292_v55, %v224_v1 }
 0x1d3   :  { %244 = vst.msk [vmem:[#allocation7] sm:$0xff] %vm63_vm0, %v242_v2 }
 0x1d4   :  { %v229_v4 = vsel %vm228_vm15, %v292_v55, %v225_v3 }
 0x1d5   :  { %v231_v5 = vmul.f32 %v229_v4, %v197_v41 }
 0x1d7   :  { %v237_v6 = vmul.f32 %v281_v58, %v231_v5 }
 0x1d9   :  { %v243_v7 = vadd.f32 %v282_v62, %v237_v6 }
 0x1db   :  { %245 = vst.msk [vmem:[#allocation7 + $0x8] sm:$0xff] %vm63_vm0, %v243_v7 }
 0x1dc   :  { %258 = dma.vmem_to_hbm [thread:$0]  %s251_s8, 256, %s253_s11, [#allocation4], %s372_s26, %s372_s26, %s373_s27  }
 0x1dd   :  { %369 = dma.done.wait [#allocation4], 256  }
 0x1de   :  { %370 = vsyncadd [#allocation4], 4294967040 }
 0x1df   :  { %263 = vsyncpa [#allocation3], 1 }
 0x1e0   :  { %264 = vsyncpa [#allocation6], 1 }
 0x1e1   :  { %265 = vsyncpa [#allocation4], 1 }

</bundles_post_ra>
